<compile_context>
chip_gen: v7x
topology: tpu7x:2x2x1
jax: 0.10.0
libtpu: 0.0.40
codegen_flags: <defaults>
</compile_context>

<pallas_src>
import math
import functools

import jax
import jax.numpy as jnp
from jax import lax
from jax.experimental import pallas as pl
from jax.experimental.pallas import tpu as pltpu


_VMEM_LIMIT = 48 * 1024 * 1024


def _fit(dim, desired):
    """Largest usable tile: `desired` if it divides dim, else the full dim."""
    if dim <= desired:
        return dim
    if dim % desired == 0:
        return desired
    # TODO(synk): pad ragged dims instead of falling back to a full-extent block.
    return dim


# --------------------- tiled matmul (bf16 inputs, f32 accumulate) ---------------------

def _matmul_kernel(x_ref, w_ref, o_ref, acc_ref):
    @pl.when(pl.program_id(2) == 0)
    def _():
        acc_ref[...] = jnp.zeros_like(acc_ref)

    acc_ref[...] += jnp.dot(x_ref[...], w_ref[...], preferred_element_type=jnp.float32)

    @pl.when(pl.program_id(2) == pl.num_programs(2) - 1)
    def _():
        o_ref[...] = acc_ref[...].astype(o_ref.dtype)


def pallas_matmul(x, w, *, out_dtype=None, tm=256, tn=256, tk=512):
    """x: (M, K), w: (K, N) -> (M, N). Output dtype follows x unless overridden."""
    M, K = x.shape
    K2, N = w.shape
    assert K == K2
    out_dtype = out_dtype if out_dtype is not None else x.dtype
    tm, tn, tk = _fit(M, tm), _fit(N, tn), _fit(K, tk)
    grid = (M // tm, N // tn, K // tk)
    return pl.pallas_call(
        _matmul_kernel,
        out_shape=jax.ShapeDtypeStruct((M, N), out_dtype),
        grid_spec=pltpu.PrefetchScalarGridSpec(
            num_scalar_prefetch=0,
            grid=grid,
            in_specs=[
                pl.BlockSpec((tm, tk), lambda i, j, k: (i, k)),
                pl.BlockSpec((tk, tn), lambda i, j, k: (k, j)),
            ],
            out_specs=pl.BlockSpec((tm, tn), lambda i, j, k: (i, j)),
            scratch_shapes=[pltpu.VMEM((tm, tn), jnp.float32)],
        ),
        compiler_params=pltpu.CompilerParams(
            dimension_semantics=("parallel", "parallel", "arbitrary"),
            vmem_limit_bytes=_VMEM_LIMIT,
        ),
    )(x, w)


# ---------------- flash-style causal attention (online softmax, KV-tiled) ----------------

def _flash_kernel(q_ref, k_ref, v_ref, o_ref, m_sc, l_sc, acc_sc, *, tq, tkv):
    qi = pl.program_id(2)
    kv = pl.program_id(3)

    @pl.when(kv == 0)
    def _():
        m_sc[...] = jnp.full_like(m_sc, -1e30)
        l_sc[...] = jnp.zeros_like(l_sc)
        acc_sc[...] = jnp.zeros_like(acc_sc)

    first_q_row = qi * tq
    last_q_row = first_q_row + (tq - 1)
    first_kv_col = kv * tkv
    last_kv_col = first_kv_col + (tkv - 1)

    is_visible = first_kv_col <= last_q_row          # block intersects lower triangle
    is_full = last_kv_col <= first_q_row             # block entirely below diagonal

    def _body(masked):
        q = q_ref[...]   # (tq, hd)  bf16, softmax scale already folded in
        k = k_ref[...]   # (tkv, hd) bf16
        v = v_ref[...]   # (tkv, hd) bf16

        # q @ k^T on the MXU, f32 scores.
        s = lax.dot_general(
            q, k, (((1,), (1,)), ((), ())), preferred_element_type=jnp.float32
        )  # (tq, tkv)

        if masked:
            row = first_q_row + lax.broadcasted_iota(jnp.int32, (tq, tkv), 0)
            col = first_kv_col + lax.broadcasted_iota(jnp.int32, (tq, tkv), 1)
            s = jnp.where(col <= row, s, -1e30)

        m_prev = m_sc[...]
        m_new = jnp.maximum(m_prev, jnp.max(s, axis=-1, keepdims=True))
        alpha = jnp.exp(m_prev - m_new)
        p = jnp.exp(s - m_new)
        l_sc[...] = alpha * l_sc[...] + jnp.sum(p, axis=-1, keepdims=True)
        acc_sc[...] = alpha * acc_sc[...] + jnp.dot(
            p.astype(v.dtype), v, preferred_element_type=jnp.float32
        )
        m_sc[...] = m_new

    # Fully-visible blocks: no mask, no iotas (VALU saved on every off-diag block).
    @pl.when(is_full)
    def _():
        _body(masked=False)

    # Diagonal blocks: apply the causal mask.
    @pl.when(jnp.logical_and(is_visible, jnp.logical_not(is_full)))
    def _():
        _body(masked=True)

    @pl.when(kv == pl.num_programs(3) - 1)
    def _():
        inv_l = pl.reciprocal(l_sc[...], approx=True)  # EUP, off the VALU slot
        o_ref[...] = (acc_sc[...] * inv_l).astype(o_ref.dtype)


def pallas_flash_attention(q, k, v, *, tq=256, tkv=512):
    """q, k, v: (B, H, S, hd) bf16 (scale pre-folded into q). Returns (B, H, S, hd) bf16."""
    B, H, S, hd = q.shape
    tq, tkv = _fit(S, tq), _fit(S, tkv)
    grid = (B, H, S // tq, S // tkv)

    qo_spec = pl.BlockSpec(
        (pl.Squeezed(), pl.Squeezed(), tq, hd), lambda b, h, qi, kv: (b, h, qi, 0)
    )

    # Clamp the kv block index to the last causally-visible block for this q block.
    # Pallas skips the input DMA when the block index does not change between grid
    # steps, so KV blocks strictly above the diagonal are never fetched.
    def kv_index_map(b, h, qi, kv):
        kv_max = (qi * tq + (tq - 1)) // tkv
        return (b, h, jnp.minimum(kv, kv_max), 0)

    kv_spec = pl.BlockSpec(
        (pl.Squeezed(), pl.Squeezed(), tkv, hd), kv_index_map
    )

    return pl.pallas_call(
        functools.partial(_flash_kernel, tq=tq, tkv=tkv),
        out_shape=jax.ShapeDtypeStruct((B, H, S, hd), q.dtype),
        grid_spec=pltpu.PrefetchScalarGridSpec(
            num_scalar_prefetch=0,
            grid=grid,
            in_specs=[qo_spec, kv_spec, kv_spec],
            out_specs=qo_spec,
            scratch_shapes=[
                pltpu.VMEM((tq, 1), jnp.float32),    # running max m
                pltpu.VMEM((tq, 1), jnp.float32),    # running denom l
                pltpu.VMEM((tq, hd), jnp.float32),   # f32 output accumulator
            ],
        ),
        compiler_params=pltpu.CompilerParams(
            # Leading axes parallel so both TensorCores (v7x) get work;
            # only the KV (reduction) axis is arbitrary.
            dimension_semantics=("parallel", "parallel", "parallel", "arbitrary"),
            vmem_limit_bytes=_VMEM_LIMIT,
        ),
    )(q, k, v)


# ------------------------------ module wrapper ------------------------------

def attention_forward(x, cos, sin, w_qkv, w_out, n_heads):
    """Pallas implementation of Attention.forward.

    x:       (B, S, D)
    cos/sin: (S, D // n_heads // 2)   -- real/imag parts of freqs_cis
    w_qkv:   (3D, D), w_out: (D, D)   -- PyTorch Linear weight layout (out, in)
    """
    B, S, D = x.shape
    hd = D // n_heads
    scale = 1.0 / math.sqrt(hd)

    # bf16 on the MXU, f32 accumulation inside the kernels.
    xb = x.astype(jnp.bfloat16).reshape(B * S, D)
    wq = w_qkv.T.astype(jnp.bfloat16)   # (D, 3D)
    wo = w_out.T.astype(jnp.bfloat16)   # (D, D)

    # QKV projection (tiled Pallas matmul): (B*S, D) @ (D, 3D) -> bf16.
    qkv = pallas_matmul(xb, wq)                                  # (B*S, 3D)
    qkv = qkv.reshape(B, S, 3, n_heads, hd)
    q, k, v = qkv[:, :, 0], qkv[:, :, 1], qkv[:, :, 2]           # (B, S, H, hd)

    # Interleaved RoPE as plain elementwise math in f32 (no MXU rotmat matmul;
    # XLA fuses it with the head transpose that feeds the attention kernel).
    # TODO(synk): fuse RoPE + head split into the QKV-projection kernel epilogue
    # to drop one HBM round-trip of q/k.
    def rope(t):
        tf = t.astype(jnp.float32).reshape(B, S, n_heads, hd // 2, 2)
        a, b = tf[..., 0], tf[..., 1]
        c = cos[None, :, None, :]
        s_ = sin[None, :, None, :]
        return jnp.stack([a * c - b * s_, a * s_ + b * c], axis=-1).reshape(
            B, S, n_heads, hd
        )

    q = rope(q) * scale          # fold the 1/sqrt(hd) softmax scale into q
    k = rope(k)

    # TODO(synk): select heads via the BlockSpec index_map to drop these transposes.
    to_bhsd = lambda t: jnp.transpose(t, (0, 2, 1, 3)).astype(jnp.bfloat16)
    q, k, v = to_bhsd(q), to_bhsd(k), to_bhsd(v)                 # (B, H, S, hd) bf16

    out = pallas_flash_attention(q, k, v)                        # (B, H, S, hd) bf16
    out = jnp.transpose(out, (0, 2, 1, 3)).reshape(B * S, D)

    # Output projection (tiled Pallas matmul), final result in f32 like the module.
    y = pallas_matmul(out, wo, out_dtype=jnp.float32)            # (B*S, D)
    return y.reshape(B, S, D)


# ------------------------------ pure-JAX reference ------------------------------

def attention_reference(x, cos, sin, w_qkv, w_out, n_heads):
    B, S, D = x.shape
    hd = D // n_heads
    qkv = x @ w_qkv.T
    q, k, v = jnp.split(qkv, 3, axis=-1)
    q = q.reshape(B, S, n_heads, hd)
    k = k.reshape(B, S, n_heads, hd)
    v = v.reshape(B, S, n_heads, hd)

    def rope(t):
        tr = t.reshape(B, S, n_heads, hd // 2, 2)
        a, b = tr[..., 0], tr[..., 1]
        c = cos[None, :, None, :]
        s = sin[None, :, None, :]
        return jnp.stack([a * c - b * s, a * s + b * c], axis=-1).reshape(
            B, S, n_heads, hd
        )

    q, k = rope(q), rope(k)
    q = q.transpose(0, 2, 1, 3)
    k = k.transpose(0, 2, 1, 3)
    v = v.transpose(0, 2, 1, 3)

    scores = jnp.einsum("bhqd,bhkd->bhqk", q, k) / math.sqrt(hd)
    mask = jnp.tril(jnp.ones((S, S), bool))
    scores = jnp.where(mask[None, None], scores, -1e30)
    attn = jax.nn.softmax(scores, axis=-1)
    out = jnp.einsum("bhqk,bhkd->bhqd", attn, v)
    out = out.transpose(0, 2, 1, 3).reshape(B, S, D)
    return out @ w_out.T


# ----------------------------------- main -----------------------------------

if __name__ == "__main__":
    B, S, D, H = 2, 8, 32, 4
    hd = D // H

    key = jax.random.PRNGKey(0)
    kx, kq, ko = jax.random.split(key, 3)

    x = jax.random.normal(kx, (B, S, D), jnp.float32)
    # Deterministic "Linear" weights (PyTorch layout: (out_features, in_features)).
    bound = 1.0 / math.sqrt(D)
    w_qkv = jax.random.uniform(kq, (3 * D, D), jnp.float32, -bound, bound)
    w_out = jax.random.uniform(ko, (D, D), jnp.float32, -bound, bound)

    # freqs_cis = exp(i * pos * inv_freq)  -> cos/sin tables of shape (S, hd//2)
    inv_freq = 1.0 / (10000.0 ** (jnp.arange(0, hd, 2, dtype=jnp.float32) / hd))
    angles = jnp.arange(S, dtype=jnp.float32)[:, None] * inv_freq[None, :]
    cos, sin = jnp.cos(angles), jnp.sin(angles)

    y = attention_forward(x, cos, sin, w_qkv, w_out, H)
    y = jax.block_until_ready(y)

    y_ref = attention_reference(x, cos, sin, w_qkv, w_out, H)
    assert y.shape == (B, S, D)
    # bf16 MXU inputs (f32 accumulation) -> looser tolerance than a pure-f32 path.
    assert jnp.allclose(y, y_ref, atol=5e-2, rtol=5e-2), "mismatch vs reference"

    print("KERNEL_OK")
</pallas_src>

<mosaic_0001>
module attributes {stable_mosaic.version = 11 : i64} {
  func.func @_matmul_kernel(%arg0: i32, %arg1: i32, %arg2: i32, %arg3: memref<16x32xbf16, #tpu.memory_space<vmem>>, %arg4: memref<32x96xbf16, #tpu.memory_space<vmem>>, %arg5: memref<16x96xbf16, #tpu.memory_space<vmem>>, %arg6: memref<16x96xf32, #tpu.memory_space<vmem>>) attributes {dimension_semantics = [#tpu.dimension_semantics<parallel>, #tpu.dimension_semantics<parallel>, #tpu.dimension_semantics<arbitrary>], iteration_bounds = array<i64: 1, 1, 1>, scalar_prefetch = 0 : i64, scratch_operands = 1 : i64, tpu.core_type = #tpu.core_type<tc>, window_params = [{transform_indices = @transform_0, window_bounds = array<i64: 16, 32>}, {transform_indices = @transform_1, window_bounds = array<i64: 32, 96>}, {transform_indices = @transform_2, window_bounds = array<i64: 16, 96>}]} {
    %c0_i32 = arith.constant 0 : i32
    %0 = arith.cmpi eq, %arg2, %c0_i32 : i32
    %1 = arith.extui %0 : i1 to i32
    %c0_i32_0 = arith.constant 0 : i32
    %2 = arith.cmpi ne, %1, %c0_i32_0 : i32
    scf.if %2 {
      %cst_10 = arith.constant 0.000000e+00 : f32
      %12 = vector.broadcast %cst_10 : f32 to vector<16x96xf32>
      %c0_11 = arith.constant 0 : index
      %c0_12 = arith.constant 0 : index
      %13 = vector.load %arg6[%c0_11, %c0_12] : memref<16x96xf32, #tpu.memory_space<vmem>>, vector<16x96xf32>
      tpu.vector_store %arg6[%c0_11, %c0_12], %12 {strides = array<i32>} : memref<16x96xf32, #tpu.memory_space<vmem>>, vector<16x96xf32>,
    } else {
    }
    %c0 = arith.constant 0 : index
    %c0_1 = arith.constant 0 : index
    %3 = vector.load %arg6[%c0, %c0_1] : memref<16x96xf32, #tpu.memory_space<vmem>>, vector<16x96xf32>
    %c0_2 = arith.constant 0 : index
    %c0_3 = arith.constant 0 : index
    %4 = vector.load %arg3[%c0_2, %c0_3] : memref<16x32xbf16, #tpu.memory_space<vmem>>, vector<16x32xbf16>
    %c0_4 = arith.constant 0 : index
    %c0_5 = arith.constant 0 : index
    %5 = vector.load %arg4[%c0_4, %c0_5] : memref<32x96xbf16, #tpu.memory_space<vmem>>, vector<32x96xbf16>
    %cst = arith.constant dense<0.000000e+00> : vector<16x96xf32>
    %6 = tpu.matmul %4, %5, %cst {dimension_numbers = #tpu.dot_dimension_numbers<[1], [0], [0], [1], [0, 0, 1, 1], [], []>} : vector<16x32xbf16>, vector<32x96xbf16>, vector<16x96xf32> -> vector<16x96xf32>
    %7 = arith.addf %3, %6 : vector<16x96xf32>
    %c0_6 = arith.constant 0 : index
    %c0_7 = arith.constant 0 : index
    %8 = vector.load %arg6[%c0_6, %c0_7] : memref<16x96xf32, #tpu.memory_space<vmem>>, vector<16x96xf32>
    tpu.vector_store %arg6[%c0_6, %c0_7], %7 {strides = array<i32>} : memref<16x96xf32, #tpu.memory_space<vmem>>, vector<16x96xf32>,
    %c0_i32_8 = arith.constant 0 : i32
    %9 = arith.cmpi eq, %arg2, %c0_i32_8 : i32
    %10 = arith.extui %9 : i1 to i32
    %c0_i32_9 = arith.constant 0 : i32
    %11 = arith.cmpi ne, %10, %c0_i32_9 : i32
    scf.if %11 {
      %c0_10 = arith.constant 0 : index
      %c0_11 = arith.constant 0 : index
      %12 = vector.load %arg6[%c0_10, %c0_11] : memref<16x96xf32, #tpu.memory_space<vmem>>, vector<16x96xf32>
      %13 = arith.truncf %12 : vector<16x96xf32> to vector<16x96xbf16>
      %c0_12 = arith.constant 0 : index
      %c0_13 = arith.constant 0 : index
      %14 = vector.load %arg5[%c0_12, %c0_13] : memref<16x96xbf16, #tpu.memory_space<vmem>>, vector<16x96xbf16>
      tpu.vector_store %arg5[%c0_12, %c0_13], %13 {strides = array<i32>} : memref<16x96xbf16, #tpu.memory_space<vmem>>, vector<16x96xbf16>,
    } else {
    }
    return
  }
  func.func @transform_0(%arg0: i32, %arg1: i32, %arg2: i32) -> (i32, i32) {
    %c0_i32 = arith.constant 0 : i32
    return %arg0, %arg2 : i32, i32
  }
  func.func @transform_1(%arg0: i32, %arg1: i32, %arg2: i32) -> (i32, i32) {
    %c0_i32 = arith.constant 0 : i32
    return %arg2, %arg1 : i32, i32
  }
  func.func @transform_2(%arg0: i32, %arg1: i32, %arg2: i32) -> (i32, i32) {
    %c0_i32 = arith.constant 0 : i32
    return %arg0, %arg1 : i32, i32
  }
}

</mosaic_0001>

<bundles_post_ra>
// kernel: tpu_custom_call.1
= control target key start
LH: loop header
LB: loop body
LE: loop exit
PB: predicated region body
PF: predicated region fallthrough
CT: control target
= control target key end

     0   :  { %7 = vsyncpa [#allocation4], 0  ;;  %s329_s0 = inlined_call_operand.hbm [shape: bf16[16,32], index: 0, kind: input, shape index: {}]   ;;  %s330_s1 = inlined_call_operand.hbm [shape: bf16[32,96], index: 1, kind: input, shape index: {}]   ;;  %s331_s2 = inlined_call_operand.hbm [shape: bf16[16,96], index: 2, kind: output, shape index: {}]  }
   0x1   :  { %8 = vsyncpa [#allocation7], 0 }
   0x2   :  { %9 = vsyncpa [#allocation5], 0  ;;  %s258_s9 = smov [#allocation3]   ;;  %s186_s13 = scalar_lea.hbm %s329_s0, 128 }
   0x3   :  { %s15_s10 = sshll.u32 %s258_s9, 4  ;;  %p187_p0 = scmp.ne.s32.totalorder %s329_s0, %s186_s13  ;;  %s16_s10 = int_to_ptr.vmem [resolvable:$true] %s15_s10 }
   0x4   :  { %p190_p1 = scmp.lt.u32.totalorder %s186_s13, %s329_s0 }
   0x6   :  { %p192_p2 = pnand %p190_p1, %p187_p0 }
   0x8   :  { %195 = shalt.err (!%p192_p2)
}
   0x9   :  { %s196_s18 = scalar_lea.vmem %s16_s10, 128  ;;  %p201_p4 = scmp.lt.s32.totalorder %s16_s10, %s16_s10 }
   0xa   :  { %p197_p3 = scmp.ne.s32.totalorder %s16_s10, %s196_s18  ;;  %p202_p5 = scmp.lt.s32.totalorder %s196_s18, %s196_s18 }
   0xc   :  { %p203_p6 = por %p202_p5, %p201_p4 }
   0xe   :  { %p204_p7 = pnand %p203_p6, %p197_p3 }
  0x10   :  { %207 = shalt.err (!%p204_p7)
}
  0x11   :  { %s259_s19 = smov 64   ;;  %s260_s20 = smov 4  }
  0x12   :  { %21 = dma.hbm_to_vmem [thread:$0]  %s329_s0, 128, %s16_s10, [#allocation4], %s259_s19, %s259_s19, %s260_s20  }
  0x13   :  { %s261_s23 = smov [#allocation6]   ;;  %s208_s27 = scalar_lea.hbm %s330_s1, 256 }
  0x14   :  { %s27_s24 = sshll.u32 %s261_s23, 4  ;;  %p209_p8 = scmp.ne.s32.totalorder %s330_s1, %s208_s27  ;;  %s28_s24 = int_to_ptr.vmem [resolvable:$true] %s27_s24 }
  0x15   :  { %p212_p9 = scmp.lt.u32.totalorder %s208_s27, %s330_s1 }
  0x17   :  { %p214_p10 = pnand %p212_p9, %p209_p8 }
  0x19   :  { %217 = shalt.err (!%p214_p10)
}
  0x1a   :  { %s218_s4 = scalar_lea.vmem %s28_s24, 256  ;;  %p223_p12 = scmp.lt.s32.totalorder %s28_s24, %s28_s24 }
  0x1b   :  { %p219_p11 = scmp.ne.s32.totalorder %s28_s24, %s218_s4  ;;  %p224_p13 = scmp.lt.s32.totalorder %s218_s4, %s218_s4 }
  0x1d   :  { %p225_p0 = por %p224_p13, %p223_p12 }
  0x1f   :  { %p226_p1 = pnand %p225_p0, %p219_p11 }
  0x21   :  { %229 = shalt.err (!%p226_p1)
}
  0x22   :  { %33 = dma.hbm_to_vmem [thread:$0]  %s330_s1, 256, %s28_s24, [#allocation7], %s259_s19, %s259_s19, %s260_s20  }
  0x23   :  { %252 = dma.done.wait [#allocation4], 128  }
  0x24   :  { %253 = vsyncadd [#allocation4], 4294967168 }
  0x25   :  { %254 = dma.done.wait [#allocation7], 256  }
  0x26   :  { %255 = vsyncadd [#allocation7], 4294967040  ;;  %vm45_vm0 = vcmask 785408   ;;  %v262_v0 = vmov 0.0   ;;  %vm263_vm1 = vmmov 0   ;;  %v183_v1 = vld [vmem:[#allocation6] sm:$0xff]  }
  0x27   :  { %46 = vst.msk [vmem:[#allocation2] sm:$0xff] %vm45_vm0, %v262_v0  ;;  %47 = vst.msk [vmem:[#allocation2 + $0x8] sm:$0xff] %vm45_vm0, %v262_v0  ;;  %168 = vmatprep.subr.bf16.mxu0 %v262_v0  ;;  %172 = vmatprep.mubr.msk.bf16.mxu0 %vm263_vm1, %v262_v0  ;;  %v184_v2 = vld [vmem:[#allocation6 + $0x8] sm:$0xff]   ;;  %v185_v3 = vld [vmem:[#allocation3] sm:$0xff]   ;;  %vm73_vm2 = vcmask 261120   ;;  %vm136_vm3 = vcmask 781312  }
  0x28   :  { %169 = vmatpush3.bf16.msra.mxu0 %v183_v1  ;;  %s264_s1 = smov [#allocation8]  }
  0x29   :  { %170 = vmatprep.subr.bf16.mxu0 %v262_v0  ;;  %s144_s6 = sshll.u32 %s264_s1, 4  ;;  %s145_s6 = int_to_ptr.vmem [resolvable:$true] %s144_s6 }
  0x2a   :  { %s230_s7 = scalar_lea.vmem %s145_s6, 128  ;;  %p235_p3 = scmp.lt.s32.totalorder %s145_s6, %s145_s6 }
  0x2b   :  { %p231_p2 = scmp.ne.s32.totalorder %s145_s6, %s230_s7  ;;  %p236_p4 = scmp.lt.s32.totalorder %s230_s7, %s230_s7 }
  0x2c   :  { %171 = vmatpush3.bf16.msra.mxu0 %v184_v2 }
  0x2d   :  { %p237_p5 = por %p236_p4, %p235_p3 }
  0x2e   :  { %v48_v4 = vld [vmem:[#allocation2] sm:$0xff]  ;;  %v49_v6 = vld [vmem:[#allocation2 + $0x8] sm:$0xff] }
  0x2f   :  { %173 = vmatmul.mubr.msk.bf16.vlgmr.msra.gmra.mrb[0].mxu0 %vm73_vm2, %v185_v3  ;;  %p238_p6 = pnand %p237_p5, %p231_p2 }
 0x102   :  { %v111_v5 = vpop.f32.mrb[0].mxu0 }
 0x103   :  { %v118_v7 = vadd.f32 %v111_v5, %v48_v4  ;;  %v174_v8 = vpop.f32.mrb[1].mxu0 }
 0x104   :  { %v114_v9 = vpop.f32.mrb[2].mxu0 }
 0x105   :  { %121 = vst.msk [vmem:[#allocation2] sm:$0xff] %vm45_vm0, %v118_v7  ;;  %v119_v10 = vadd.f32 %v114_v9, %v49_v6  ;;  %v175_v11 = vpop.f32.mrb[3].mxu0 }
 0x107   :  { %122 = vst.msk [vmem:[#allocation2 + $0x8] sm:$0xff] %vm45_vm0, %v119_v10 }
 0x10c   :  { %v126_v12 = vld [vmem:[#allocation2] sm:$0xff] }
 0x10d   :  { %v163_v13 = vpack.c.bf16 %v126_v12, %v126_v12 }
 0x10e   :  { %v127_v14 = vld [vmem:[#allocation2 + $0x8] sm:$0xff] }
 0x10f   :  { %v164_v15 = vpack.c.bf16 %v127_v14, %v127_v14  ;;  %137 = vst.msk [vmem:[#allocation8] sm:$0xf] %vm136_vm3, %v163_v13 }
 0x111   :  { %138 = vst.msk [vmem:[#allocation8 + $0x4] sm:$0xf] %vm136_vm3, %v164_v15 }
 0x112   :  { %241 = shalt.err (!%p238_p6)
}
 0x113   :  { %s242_s10 = scalar_lea.hbm %s331_s2, 128 }
 0x114   :  { %p243_p7 = scmp.ne.s32.totalorder %s331_s2, %s242_s10  ;;  %p246_p8 = scmp.lt.u32.totalorder %s242_s10, %s331_s2 }
 0x116   :  { %p248_p9 = pnand %p246_p8, %p243_p7 }
 0x118   :  { %251 = shalt.err (!%p248_p9)
}
 0x119   :  { %150 = dma.vmem_to_hbm [thread:$0]  %s145_s6, 128, %s331_s2, [#allocation5], %s259_s19, %s259_s19, %s260_s20  }
 0x11a   :  { %256 = dma.done.wait [#allocation5], 128  }
 0x11b   :  { %257 = vsyncadd [#allocation5], 4294967168 }
 0x11c   :  { %154 = vsyncpa [#allocation4], 1 }
 0x11d   :  { %155 = vsyncpa [#allocation7], 1 }
 0x11e   :  { %156 = vsyncpa [#allocation5], 1 }

</bundles_post_ra>
